<compile_context>
chip_gen: v5e
topology: v5e:2x2
jax: 0.10.0
libtpu: 0.0.40
codegen_flags: <defaults>
</compile_context>

<pallas_src>
import functools

import jax
import jax.numpy as jnp
from jax import lax
from jax.experimental import pallas as pl
from jax.experimental.pallas import tpu as pltpu


# ----------------------------------------------------------------------------- kernel

def critic_rollout_kernel(ao_ref, io_ref, aa_ref, ia_ref, h0_ref,
                          w1a_ref, w1b_ref, w1c_ref, w1d_ref, b1_ref,
                          wg_ref, bg_ref, w2_ref, b2_ref,
                          q_ref, hout_ref, h_sc):
    """One grid step == one Critic.forward timestep; h carried in VMEM scratch."""
    t = pl.program_id(0)
    H = h_sc.shape[-1]

    @pl.when(t == 0)
    def _():
        h_sc[...] = h0_ref[...]

    h = h_sc[...]                                               # (bs, H) f32

    # fc1 (+ ReLU) with _build_inputs folded in: sum of four row-block matmuls.
    wdt = w1a_ref.dtype
    z1 = (jnp.dot(ao_ref[...].astype(wdt), w1a_ref[...], preferred_element_type=jnp.float32)
          + jnp.dot(io_ref[...].astype(wdt), w1b_ref[...], preferred_element_type=jnp.float32)
          + jnp.dot(aa_ref[...].astype(wdt), w1c_ref[...], preferred_element_type=jnp.float32)
          + jnp.dot(ia_ref[...].astype(wdt), w1d_ref[...], preferred_element_type=jnp.float32)
          + b1_ref[...])
    a = jnp.maximum(z1, 0.0)                                    # (bs, H)

    # Single fused GRU matmul: [a | h] (bs, 2H) @ Wg (2H, 4H) -> (bs, 4H) lane-dense.
    gdt = wg_ref.dtype
    cat = jnp.concatenate([a.astype(gdt), h.astype(gdt)], axis=-1)
    g = jnp.dot(cat, wg_ref[...], preferred_element_type=jnp.float32) + bg_ref[...]

    pre_r = g[:, 0:H]            # a@W_ir + h@W_hr + b_ir + b_hr
    pre_z = g[:, H:2 * H]        # a@W_iz + h@W_hz + b_iz + b_hz
    gx_n = g[:, 2 * H:3 * H]     # a@W_in + b_in
    gh_n = g[:, 3 * H:4 * H]     # h@W_hn + b_hn

    # sigmoid = 1 / (1 + exp(-x)) with the divide on the EUP approx path.
    r = pl.reciprocal(1.0 + jnp.exp(-pre_r), approx=True)
    z = pl.reciprocal(1.0 + jnp.exp(-pre_z), approx=True)
    n = jnp.tanh(gx_n + r * gh_n)
    h_new = (1.0 - z) * n + z * h                               # (bs, H)

    # fc2 into a lane-dense, zero-padded 128-wide slab (real q = first n_out cols).
    q = jnp.dot(h_new.astype(w2_ref.dtype), w2_ref[...],
                preferred_element_type=jnp.float32) + b2_ref[...]

    q_ref[...] = q
    hout_ref[...] = h_new
    h_sc[...] = h_new


# ----------------------------------------------------------------------------- wrappers

def critic_rollout(batch, h0, kp, n_out=2):
    """Run the Critic over all T timesteps in a single pallas_call.

    batch arrays: (bs, T, d) float; h0: (bs, H).
    Returns q (T, bs, n_out) and h (T, bs, H); step t equals Critic.forward(batch, h_{t-1}, t).
    """
    # Time-major so each grid step reads a full (bs, d) tile (last two block dims = full dims).
    ao = jnp.swapaxes(batch["attacker_obs"], 0, 1)
    io = jnp.swapaxes(batch["identifier_obs"], 0, 1)
    aa = jnp.swapaxes(batch["attacker_action"], 0, 1)
    ia = jnp.swapaxes(batch["identifier_action"], 0, 1)

    T, bs, _ = ao.shape
    H = h0.shape[-1]
    qpad = kp["w2_pad"].shape[-1]

    def time_spec(d):
        return pl.BlockSpec((None, bs, d), lambda t: (t, 0, 0))

    def const_spec(arr):  # full-array block, constant index -> stays VMEM-resident
        return pl.BlockSpec(arr.shape, lambda t: (0, 0))

    weights = (kp["w1_a"], kp["w1_b"], kp["w1_c"], kp["w1_d"], kp["b1"],
               kp["w_g"], kp["b_g"], kp["w2_pad"], kp["b2_pad"])

    q_all, h_all = pl.pallas_call(
        critic_rollout_kernel,
        out_shape=(jax.ShapeDtypeStruct((T, bs, qpad), jnp.float32),
                   jax.ShapeDtypeStruct((T, bs, H), jnp.float32)),
        grid_spec=pltpu.PrefetchScalarGridSpec(
            num_scalar_prefetch=0,
            grid=(T,),
            in_specs=[time_spec(ao.shape[-1]), time_spec(io.shape[-1]),
                      time_spec(aa.shape[-1]), time_spec(ia.shape[-1]),
                      const_spec(h0)] + [const_spec(w) for w in weights],
            out_specs=(pl.BlockSpec((None, bs, qpad), lambda t: (t, 0, 0)),
                       pl.BlockSpec((None, bs, H), lambda t: (t, 0, 0))),
            scratch_shapes=[pltpu.VMEM((bs, H), jnp.float32)]),
        compiler_params=pltpu.CompilerParams(
            dimension_semantics=("arbitrary",)),   # recurrence over t -> sequential
    )(ao, io, aa, ia, h0, *weights)

    return q_all[:, :, :n_out], h_all


def critic_forward(batch, hidden_states, t, kp, n_out=2):
    """Exact analogue of Critic.forward(batch, hidden_states, t): a single timestep."""
    step = {k: v[:, t:t + 1] for k, v in batch.items()}
    q, h = critic_rollout(step, hidden_states, kp, n_out=n_out)
    return q[0], h[0]


# ----------------------------------------------------------------------------- params

def init_torch_params(key, input_dims, hidden_dim, n_out=2):
    """Synthetic parameters in PyTorch layout (nn.Linear / nn.GRUCell shapes)."""
    H = hidden_dim
    D = sum(input_dims)
    ks = jax.random.split(key, 8)
    s = 0.1
    return {
        "w1":   s * jax.random.normal(ks[0], (H, D), jnp.float32),       # fc1.weight
        "b1":   s * jax.random.normal(ks[1], (H,), jnp.float32),
        "w_ih": s * jax.random.normal(ks[2], (3 * H, H), jnp.float32),   # GRUCell.weight_ih
        "b_ih": s * jax.random.normal(ks[3], (3 * H,), jnp.float32),
        "w_hh": s * jax.random.normal(ks[4], (3 * H, H), jnp.float32),   # GRUCell.weight_hh
        "b_hh": s * jax.random.normal(ks[5], (3 * H,), jnp.float32),
        "w2":   s * jax.random.normal(ks[6], (n_out, H), jnp.float32),   # fc2.weight
        "b2":   s * jax.random.normal(ks[7], (n_out,), jnp.float32),
    }


def pack_kernel_params(tp, input_dims, hidden_dim, n_out=2, qpad=128, dtype=jnp.float32):
    """Repack PyTorch-layout params into the fused, kernel-friendly layout."""
    H = hidden_dim
    d0, d1, d2, d3 = input_dims

    w1t = tp["w1"].T                       # (D, H)
    w_ih_t = tp["w_ih"].T                  # (H, 3H) columns = [ir | iz | in]
    w_hh_t = tp["w_hh"].T                  # (H, 3H) columns = [hr | hz | hn]

    zeros = jnp.zeros((H, H), jnp.float32)
    top = jnp.concatenate([w_ih_t, zeros], axis=1)                               # [ir|iz|in|0 ]
    bot = jnp.concatenate([w_hh_t[:, :2 * H], zeros, w_hh_t[:, 2 * H:]], axis=1)  # [hr|hz|0 |hn]
    w_g = jnp.concatenate([top, bot], axis=0)                                    # (2H, 4H)
    b_g = jnp.concatenate([tp["b_ih"][:2 * H] + tp["b_hh"][:2 * H],
                           tp["b_ih"][2 * H:], tp["b_hh"][2 * H:]])[None, :]     # (1, 4H)

    w2_pad = jnp.zeros((H, qpad), jnp.float32).at[:, :n_out].set(tp["w2"].T)
    b2_pad = jnp.zeros((1, qpad), jnp.float32).at[:, :n_out].set(tp["b2"][None, :])

    kp = {
        "w1_a": w1t[:d0],
        "w1_b": w1t[d0:d0 + d1],
        "w1_c": w1t[d0 + d1:d0 + d1 + d2],
        "w1_d": w1t[d0 + d1 + d2:],
        "b1": tp["b1"][None, :],
        "w_g": w_g, "b_g": b_g,
        "w2_pad": w2_pad, "b2_pad": b2_pad,
    }
    # Matmul weights may be bf16 on v6e/v7x (pass dtype=jnp.bfloat16); gate math stays f32.
    for k in ("w1_a", "w1_b", "w1_c", "w1_d", "w_g", "w2_pad"):
        kp[k] = kp[k].astype(dtype)
    return kp


# ----------------------------------------------------------------------------- reference

def reference_rollout(batch, h0, tp):
    """Pure-JAX per-step reference with exact PyTorch GRUCell semantics."""
    H = h0.shape[-1]
    xs = jnp.concatenate([batch["attacker_obs"], batch["identifier_obs"],
                          batch["attacker_action"], batch["identifier_action"]], axis=-1)
    xs = jnp.swapaxes(xs, 0, 1)        # (T, bs, D)

    def step(h, x):
        a = jnp.maximum(x @ tp["w1"].T + tp["b1"], 0.0)
        gx = a @ tp["w_ih"].T + tp["b_ih"]
        gh = h @ tp["w_hh"].T + tp["b_hh"]
        r = jax.nn.sigmoid(gx[:, :H] + gh[:, :H])
        z = jax.nn.sigmoid(gx[:, H:2 * H] + gh[:, H:2 * H])
        n = jnp.tanh(gx[:, 2 * H:] + r * gh[:, 2 * H:])
        h_new = (1.0 - z) * n + z * h
        q = h_new @ tp["w2"].T + tp["b2"]
        return h_new, (q, h_new)

    _, (qs, hs) = lax.scan(step, h0, xs)
    return qs, hs


# ----------------------------------------------------------------------------- main

if __name__ == "__main__":
    key = jax.random.PRNGKey(0)

    # Small synthetic scheme: vshapes 12 + 12 + 4 + 4 = 32 = input_shape
    bs, T = 8, 5
    obs_a, obs_i, act_a, act_i = 12, 12, 4, 4
    input_dims = (obs_a, obs_i, act_a, act_i)
    hidden_dim = 32
    n_out = 2

    k_batch, k_params = jax.random.split(key)
    kb = jax.random.split(k_batch, 4)
    batch = {
        "attacker_obs":      jax.random.normal(kb[0], (bs, T, obs_a), jnp.float32),
        "identifier_obs":    jax.random.normal(kb[1], (bs, T, obs_i), jnp.float32),
        "attacker_action":   jax.random.normal(kb[2], (bs, T, act_a), jnp.float32),
        "identifier_action": jax.random.normal(kb[3], (bs, T, act_i), jnp.float32),
    }

    tp = init_torch_params(k_params, input_dims, hidden_dim, n_out=n_out)
    kp = pack_kernel_params(tp, input_dims, hidden_dim, n_out=n_out)

    # Critic.init_hidden -> zeros, expanded to batch.
    h0 = jnp.zeros((bs, hidden_dim), jnp.float32)

    # Fused T-step rollout in a single pallas_call.
    rollout = jax.jit(functools.partial(critic_rollout, n_out=n_out))
    q_all, h_all = rollout(batch, h0, kp)
    jax.block_until_ready((q_all, h_all))

    # Single-step API identical to Critic.forward(batch, hidden_states, t).
    q_t0, h_t0 = critic_forward(batch, h0, 0, kp, n_out=n_out)
    jax.block_until_ready((q_t0, h_t0))

    # Reference check (exact sigmoid vs in-kernel EUP approx reciprocal -> loosened tol).
    q_ref, h_ref = reference_rollout(batch, h0, tp)

    assert q_all.shape == (T, bs, n_out) and h_all.shape == (T, bs, hidden_dim)
    assert jnp.allclose(q_all, q_ref, atol=3e-3, rtol=3e-3), "q mismatch"
    assert jnp.allclose(h_all, h_ref, atol=3e-3, rtol=3e-3), "h mismatch"
    assert jnp.allclose(q_t0, q_ref[0], atol=3e-3, rtol=3e-3), "single-step q mismatch"
    assert jnp.allclose(h_t0, h_ref[0], atol=3e-3, rtol=3e-3), "single-step h mismatch"

    print("KERNEL_OK")
</pallas_src>

<mosaic_0001>
module attributes {stable_mosaic.version = 11 : i64} {
  func.func @critic_rollout_kernel(%arg0: i32, %arg1: memref<1x8x12xf32, #tpu.memory_space<vmem>>, %arg2: memref<1x8x12xf32, #tpu.memory_space<vmem>>, %arg3: memref<1x8x4xf32, #tpu.memory_space<vmem>>, %arg4: memref<1x8x4xf32, #tpu.memory_space<vmem>>, %arg5: memref<8x32xf32, #tpu.memory_space<vmem>>, %arg6: memref<12x32xf32, #tpu.memory_space<vmem>>, %arg7: memref<12x32xf32, #tpu.memory_space<vmem>>, %arg8: memref<4x32xf32, #tpu.memory_space<vmem>>, %arg9: memref<4x32xf32, #tpu.memory_space<vmem>>, %arg10: memref<1x32xf32, #tpu.memory_space<vmem>>, %arg11: memref<64x128xf32, #tpu.memory_space<vmem>>, %arg12: memref<1x128xf32, #tpu.memory_space<vmem>>, %arg13: memref<32x128xf32, #tpu.memory_space<vmem>>, %arg14: memref<1x128xf32, #tpu.memory_space<vmem>>, %arg15: memref<1x8x128xf32, #tpu.memory_space<vmem>>, %arg16: memref<1x8x32xf32, #tpu.memory_space<vmem>>, %arg17: memref<8x32xf32, #tpu.memory_space<vmem>>) attributes {dimension_semantics = [#tpu.dimension_semantics<arbitrary>], iteration_bounds = array<i64: 5>, scalar_prefetch = 0 : i64, scratch_operands = 1 : i64, tpu.core_type = #tpu.core_type<tc>, window_params = [{transform_indices = @transform_0, window_bounds = array<i64: 1, 8, 12>}, {transform_indices = @transform_1, window_bounds = array<i64: 1, 8, 12>}, {transform_indices = @transform_2, window_bounds = array<i64: 1, 8, 4>}, {transform_indices = @transform_3, window_bounds = array<i64: 1, 8, 4>}, {pipeline_mode = #tpu.pipeline_mode<synchronous>, transform_indices = @transform_4, window_bounds = array<i64: 8, 32>}, {pipeline_mode = #tpu.pipeline_mode<synchronous>, transform_indices = @transform_5, window_bounds = array<i64: 12, 32>}, {pipeline_mode = #tpu.pipeline_mode<synchronous>, transform_indices = @transform_6, window_bounds = array<i64: 12, 32>}, {pipeline_mode = #tpu.pipeline_mode<synchronous>, transform_indices = @transform_7, window_bounds = array<i64: 4, 32>}, {pipeline_mode = #tpu.pipeline_mode<synchronous>, transform_indices = @transform_8, window_bounds = array<i64: 4, 32>}, {pipeline_mode = #tpu.pipeline_mode<synchronous>, transform_indices = @transform_9, window_bounds = array<i64: 1, 32>}, {pipeline_mode = #tpu.pipeline_mode<synchronous>, transform_indices = @transform_10, window_bounds = array<i64: 64, 128>}, {pipeline_mode = #tpu.pipeline_mode<synchronous>, transform_indices = @transform_11, window_bounds = array<i64: 1, 128>}, {pipeline_mode = #tpu.pipeline_mode<synchronous>, transform_indices = @transform_12, window_bounds = array<i64: 32, 128>}, {pipeline_mode = #tpu.pipeline_mode<synchronous>, transform_indices = @transform_13, window_bounds = array<i64: 1, 128>}, {transform_indices = @transform_14, window_bounds = array<i64: 1, 8, 128>}, {transform_indices = @transform_15, window_bounds = array<i64: 1, 8, 32>}]} {
    %c0_i32 = arith.constant 0 : i32
    %0 = arith.cmpi eq, %arg0, %c0_i32 : i32
    %1 = arith.extui %0 : i1 to i32
    %c0_i32_0 = arith.constant 0 : i32
    %2 = arith.cmpi ne, %1, %c0_i32_0 : i32
    scf.if %2 {
      %c0_51 = arith.constant 0 : index
      %c0_52 = arith.constant 0 : index
      %70 = vector.load %arg5[%c0_51, %c0_52] : memref<8x32xf32, #tpu.memory_space<vmem>>, vector<8x32xf32>
      %c0_53 = arith.constant 0 : index
      %c0_54 = arith.constant 0 : index
      %71 = vector.load %arg17[%c0_53, %c0_54] : memref<8x32xf32, #tpu.memory_space<vmem>>, vector<8x32xf32>
      tpu.vector_store %arg17[%c0_53, %c0_54], %70 {strides = array<i32>} : memref<8x32xf32, #tpu.memory_space<vmem>>, vector<8x32xf32>,
    } else {
    }
    %c0 = arith.constant 0 : index
    %c0_1 = arith.constant 0 : index
    %3 = vector.load %arg17[%c0, %c0_1] : memref<8x32xf32, #tpu.memory_space<vmem>>, vector<8x32xf32>
    %c0_2 = arith.constant 0 : index
    %c0_3 = arith.constant 0 : index
    %c0_4 = arith.constant 0 : index
    %4 = vector.load %arg1[%c0_2, %c0_3, %c0_4] : memref<1x8x12xf32, #tpu.memory_space<vmem>>, vector<1x8x12xf32>
    %5 = vector.shape_cast %4 : vector<1x8x12xf32> to vector<8x12xf32>
    %c0_5 = arith.constant 0 : index
    %c0_6 = arith.constant 0 : index
    %6 = vector.load %arg6[%c0_5, %c0_6] : memref<12x32xf32, #tpu.memory_space<vmem>>, vector<12x32xf32>
    %cst = arith.constant dense<0.000000e+00> : vector<8x32xf32>
    %7 = tpu.matmul %5, %6, %cst {dimension_numbers = #tpu.dot_dimension_numbers<[1], [0], [0], [1], [0, 0, 1, 1], [], []>} : vector<8x12xf32>, vector<12x32xf32>, vector<8x32xf32> -> vector<8x32xf32>
    %c0_7 = arith.constant 0 : index
    %c0_8 = arith.constant 0 : index
    %c0_9 = arith.constant 0 : index
    %8 = vector.load %arg2[%c0_7, %c0_8, %c0_9] : memref<1x8x12xf32, #tpu.memory_space<vmem>>, vector<1x8x12xf32>
    %9 = vector.shape_cast %8 : vector<1x8x12xf32> to vector<8x12xf32>
    %c0_10 = arith.constant 0 : index
    %c0_11 = arith.constant 0 : index
    %10 = vector.load %arg7[%c0_10, %c0_11] : memref<12x32xf32, #tpu.memory_space<vmem>>, vector<12x32xf32>
    %cst_12 = arith.constant dense<0.000000e+00> : vector<8x32xf32>
    %11 = tpu.matmul %9, %10, %cst_12 {dimension_numbers = #tpu.dot_dimension_numbers<[1], [0], [0], [1], [0, 0, 1, 1], [], []>} : vector<8x12xf32>, vector<12x32xf32>, vector<8x32xf32> -> vector<8x32xf32>
    %12 = arith.addf %7, %11 : vector<8x32xf32>
    %c0_13 = arith.constant 0 : index
    %c0_14 = arith.constant 0 : index
    %c0_15 = arith.constant 0 : index
    %13 = vector.load %arg3[%c0_13, %c0_14, %c0_15] : memref<1x8x4xf32, #tpu.memory_space<vmem>>, vector<1x8x4xf32>
    %14 = vector.shape_cast %13 : vector<1x8x4xf32> to vector<8x4xf32>
    %c0_16 = arith.constant 0 : index
    %c0_17 = arith.constant 0 : index
    %15 = vector.load %arg8[%c0_16, %c0_17] : memref<4x32xf32, #tpu.memory_space<vmem>>, vector<4x32xf32>
    %cst_18 = arith.constant dense<0.000000e+00> : vector<8x32xf32>
    %16 = tpu.matmul %14, %15, %cst_18 {dimension_numbers = #tpu.dot_dimension_numbers<[1], [0], [0], [1], [0, 0, 1, 1], [], []>} : vector<8x4xf32>, vector<4x32xf32>, vector<8x32xf32> -> vector<8x32xf32>
    %17 = arith.addf %12, %16 : vector<8x32xf32>
    %c0_19 = arith.constant 0 : index
    %c0_20 = arith.constant 0 : index
    %c0_21 = arith.constant 0 : index
    %18 = vector.load %arg4[%c0_19, %c0_20, %c0_21] : memref<1x8x4xf32, #tpu.memory_space<vmem>>, vector<1x8x4xf32>
    %19 = vector.shape_cast %18 : vector<1x8x4xf32> to vector<8x4xf32>
    %c0_22 = arith.constant 0 : index
    %c0_23 = arith.constant 0 : index
    %20 = vector.load %arg9[%c0_22, %c0_23] : memref<4x32xf32, #tpu.memory_space<vmem>>, vector<4x32xf32>
    %cst_24 = arith.constant dense<0.000000e+00> : vector<8x32xf32>
    %21 = tpu.matmul %19, %20, %cst_24 {dimension_numbers = #tpu.dot_dimension_numbers<[1], [0], [0], [1], [0, 0, 1, 1], [], []>} : vector<8x4xf32>, vector<4x32xf32>, vector<8x32xf32> -> vector<8x32xf32>
    %22 = arith.addf %17, %21 : vector<8x32xf32>
    %c0_25 = arith.constant 0 : index
    %c0_26 = arith.constant 0 : index
    %23 = vector.load %arg10[%c0_25, %c0_26] : memref<1x32xf32, #tpu.memory_space<vmem>>, vector<1x32xf32>
    %24 = vector.broadcast %23 : vector<1x32xf32> to vector<8x32xf32>
    %25 = arith.addf %22, %24 : vector<8x32xf32>
    %cst_27 = arith.constant 0.000000e+00 : f32
    %26 = vector.broadcast %cst_27 : f32 to vector<8x32xf32>
    %27 = arith.maximumf %25, %26 : vector<8x32xf32>
    %28 = tpu.concatenate %27, %3 in 1 : vector<8x32xf32>, vector<8x32xf32> -> vector<8x64xf32>
    %c0_28 = arith.constant 0 : index
    %c0_29 = arith.constant 0 : index
    %29 = vector.load %arg11[%c0_28, %c0_29] : memref<64x128xf32, #tpu.memory_space<vmem>>, vector<64x128xf32>
    %cst_30 = arith.constant dense<0.000000e+00> : vector<8x128xf32>
    %30 = tpu.matmul %28, %29, %cst_30 {dimension_numbers = #tpu.dot_dimension_numbers<[1], [0], [0], [1], [0, 0, 1, 1], [], []>} : vector<8x64xf32>, vector<64x128xf32>, vector<8x128xf32> -> vector<8x128xf32>
    %c0_31 = arith.constant 0 : index
    %c0_32 = arith.constant 0 : index
    %31 = vector.load %arg12[%c0_31, %c0_32] : memref<1x128xf32, #tpu.memory_space<vmem>>, vector<1x128xf32>
    %32 = vector.broadcast %31 : vector<1x128xf32> to vector<8x128xf32>
    %33 = arith.addf %30, %32 : vector<8x128xf32>
    %34 = vector.extract_strided_slice %33 {offsets = [0, 0], sizes = [8, 32], strides = [1, 1]} : vector<8x128xf32> to vector<8x32xf32>
    %35 = vector.extract_strided_slice %33 {offsets = [0, 32], sizes = [8, 32], strides = [1, 1]} : vector<8x128xf32> to vector<8x32xf32>
    %36 = vector.extract_strided_slice %33 {offsets = [0, 64], sizes = [8, 32], strides = [1, 1]} : vector<8x128xf32> to vector<8x32xf32>
    %37 = vector.extract_strided_slice %33 {offsets = [0, 96], sizes = [8, 32], strides = [1, 1]} : vector<8x128xf32> to vector<8x32xf32>
    %cst_33 = arith.constant 0.000000e+00 : f32
    %38 = vector.broadcast %cst_33 : f32 to vector<8x32xf32>
    %39 = arith.subf %38, %34 : vector<8x32xf32>
    %40 = math.exp %39 : vector<8x32xf32>
    %cst_34 = arith.constant 1.000000e+00 : f32
    %41 = vector.broadcast %cst_34 : f32 to vector<8x32xf32>
    %42 = arith.addf %41, %40 : vector<8x32xf32>
    %43 = tpu.reciprocal %42 {approx = true} : vector<8x32xf32> -> vector<8x32xf32>
    %cst_35 = arith.constant 0.000000e+00 : f32
    %44 = vector.broadcast %cst_35 : f32 to vector<8x32xf32>
    %45 = arith.subf %44, %35 : vector<8x32xf32>
    %46 = math.exp %45 : vector<8x32xf32>
    %cst_36 = arith.constant 1.000000e+00 : f32
    %47 = vector.broadcast %cst_36 : f32 to vector<8x32xf32>
    %48 = arith.addf %47, %46 : vector<8x32xf32>
    %49 = tpu.reciprocal %48 {approx = true} : vector<8x32xf32> -> vector<8x32xf32>
    %50 = arith.mulf %43, %37 : vector<8x32xf32>
    %51 = arith.addf %36, %50 : vector<8x32xf32>
    %52 = math.tanh %51 : vector<8x32xf32>
    %cst_37 = arith.constant 1.000000e+00 : f32
    %53 = vector.broadcast %cst_37 : f32 to vector<8x32xf32>
    %54 = arith.subf %53, %49 : vector<8x32xf32>
    %55 = arith.mulf %54, %52 : vector<8x32xf32>
    %56 = arith.mulf %49, %3 : vector<8x32xf32>
    %57 = arith.addf %55, %56 : vector<8x32xf32>
    %c0_38 = arith.constant 0 : index
    %c0_39 = arith.constant 0 : index
    %58 = vector.load %arg13[%c0_38, %c0_39] : memref<32x128xf32, #tpu.memory_space<vmem>>, vector<32x128xf32>
    %cst_40 = arith.constant dense<0.000000e+00> : vector<8x128xf32>
    %59 = tpu.matmul %57, %58, %cst_40 {dimension_numbers = #tpu.dot_dimension_numbers<[1], [0], [0], [1], [0, 0, 1, 1], [], []>} : vector<8x32xf32>, vector<32x128xf32>, vector<8x128xf32> -> vector<8x128xf32>
    %c0_41 = arith.constant 0 : index
    %c0_42 = arith.constant 0 : index
    %60 = vector.load %arg14[%c0_41, %c0_42] : memref<1x128xf32, #tpu.memory_space<vmem>>, vector<1x128xf32>
    %61 = vector.broadcast %60 : vector<1x128xf32> to vector<8x128xf32>
    %62 = arith.addf %59, %61 : vector<8x128xf32>
    %c0_43 = arith.constant 0 : index
    %c0_44 = arith.constant 0 : index
    %c0_45 = arith.constant 0 : index
    %63 = vector.load %arg15[%c0_43, %c0_44, %c0_45] : memref<1x8x128xf32, #tpu.memory_space<vmem>>, vector<1x8x128xf32>
    %64 = vector.shape_cast %63 : vector<1x8x128xf32> to vector<8x128xf32>
    %65 = vector.shape_cast %62 : vector<8x128xf32> to vector<1x8x128xf32>
    tpu.vector_store %arg15[%c0_43, %c0_44, %c0_45], %65 {strides = array<i32>} : memref<1x8x128xf32, #tpu.memory_space<vmem>>, vector<1x8x128xf32>,
    %c0_46 = arith.constant 0 : index
    %c0_47 = arith.constant 0 : index
    %c0_48 = arith.constant 0 : index
    %66 = vector.load %arg16[%c0_46, %c0_47, %c0_48] : memref<1x8x32xf32, #tpu.memory_space<vmem>>, vector<1x8x32xf32>
    %67 = vector.shape_cast %66 : vector<1x8x32xf32> to vector<8x32xf32>
    %68 = vector.shape_cast %57 : vector<8x32xf32> to vector<1x8x32xf32>
    tpu.vector_store %arg16[%c0_46, %c0_47, %c0_48], %68 {strides = array<i32>} : memref<1x8x32xf32, #tpu.memory_space<vmem>>, vector<1x8x32xf32>,
    %c0_49 = arith.constant 0 : index
    %c0_50 = arith.constant 0 : index
    %69 = vector.load %arg17[%c0_49, %c0_50] : memref<8x32xf32, #tpu.memory_space<vmem>>, vector<8x32xf32>
    tpu.vector_store %arg17[%c0_49, %c0_50], %57 {strides = array<i32>} : memref<8x32xf32, #tpu.memory_space<vmem>>, vector<8x32xf32>,
    return
  }
  func.func @transform_0(%arg0: i32) -> (i32, i32, i32) {
    %c0_i32 = arith.constant 0 : i32
    %c0_i32_0 = arith.constant 0 : i32
    %c0_i32_1 = arith.constant 0 : i32
    return %arg0, %c0_i32, %c0_i32_0 : i32, i32, i32
  }
  func.func @transform_1(%arg0: i32) -> (i32, i32, i32) {
    %c0_i32 = arith.constant 0 : i32
    %c0_i32_0 = arith.constant 0 : i32
    %c0_i32_1 = arith.constant 0 : i32
    return %arg0, %c0_i32, %c0_i32_0 : i32, i32, i32
  }
  func.func @transform_2(%arg0: i32) -> (i32, i32, i32) {
    %c0_i32 = arith.constant 0 : i32
    %c0_i32_0 = arith.constant 0 : i32
    %c0_i32_1 = arith.constant 0 : i32
    return %arg0, %c0_i32, %c0_i32_0 : i32, i32, i32
  }
  func.func @transform_3(%arg0: i32) -> (i32, i32, i32) {
    %c0_i32 = arith.constant 0 : i32
    %c0_i32_0 = arith.constant 0 : i32
    %c0_i32_1 = arith.constant 0 : i32
    return %arg0, %c0_i32, %c0_i32_0 : i32, i32, i32
  }
  func.func @transform_4(%arg0: i32) -> (i32, i32) {
    %c0_i32 = arith.constant 0 : i32
    %c0_i32_0 = arith.constant 0 : i32
    %c0_i32_1 = arith.constant 0 : i32
    return %c0_i32, %c0_i32_0 : i32, i32
  }
  func.func @transform_5(%arg0: i32) -> (i32, i32) {
    %c0_i32 = arith.constant 0 : i32
    %c0_i32_0 = arith.constant 0 : i32
    %c0_i32_1 = arith.constant 0 : i32
    return %c0_i32, %c0_i32_0 : i32, i32
  }
  func.func @transform_6(%arg0: i32) -> (i32, i32) {
    %c0_i32 = arith.constant 0 : i32
    %c0_i32_0 = arith.constant 0 : i32
    %c0_i32_1 = arith.constant 0 : i32
    return %c0_i32, %c0_i32_0 : i32, i32
  }
  func.func @transform_7(%arg0: i32) -> (i32, i32) {
    %c0_i32 = arith.constant 0 : i32
    %c0_i32_0 = arith.constant 0 : i32
    %c0_i32_1 = arith.constant 0 : i32
    return %c0_i32, %c0_i32_0 : i32, i32
  }
  func.func @transform_8(%arg0: i32) -> (i32, i32) {
    %c0_i32 = arith.constant 0 : i32
    %c0_i32_0 = arith.constant 0 : i32
    %c0_i32_1 = arith.constant 0 : i32
    return %c0_i32, %c0_i32_0 : i32, i32
  }
  func.func @transform_9(%arg0: i32) -> (i32, i32) {
    %c0_i32 = arith.constant 0 : i32
    %c0_i32_0 = arith.constant 0 : i32
    %c0_i32_1 = arith.constant 0 : i32
    return %c0_i32, %c0_i32_0 : i32, i32
  }
  func.func @transform_10(%arg0: i32) -> (i32, i32) {
    %c0_i32 = arith.constant 0 : i32
    %c0_i32_0 = arith.constant 0 : i32
    %c0_i32_1 = arith.constant 0 : i32
    return %c0_i32, %c0_i32_0 : i32, i32
  }
  func.func @transform_11(%arg0: i32) -> (i32, i32) {
    %c0_i32 = arith.constant 0 : i32
    %c0_i32_0 = arith.constant 0 : i32
    %c0_i32_1 = arith.constant 0 : i32
    return %c0_i32, %c0_i32_0 : i32, i32
  }
  func.func @transform_12(%arg0: i32) -> (i32, i32) {
    %c0_i32 = arith.constant 0 : i32
    %c0_i32_0 = arith.constant 0 : i32
    %c0_i32_1 = arith.constant 0 : i32
    return %c0_i32, %c0_i32_0 : i32, i32
  }
  func.func @transform_13(%arg0: i32) -> (i32, i32) {
    %c0_i32 = arith.constant 0 : i32
    %c0_i32_0 = arith.constant 0 : i32
    %c0_i32_1 = arith.constant 0 : i32
    return %c0_i32, %c0_i32_0 : i32, i32
  }
  func.func @transform_14(%arg0: i32) -> (i32, i32, i32) {
    %c0_i32 = arith.constant 0 : i32
    %c0_i32_0 = arith.constant 0 : i32
    %c0_i32_1 = arith.constant 0 : i32
    return %arg0, %c0_i32, %c0_i32_0 : i32, i32, i32
  }
  func.func @transform_15(%arg0: i32) -> (i32, i32, i32) {
    %c0_i32 = arith.constant 0 : i32
    %c0_i32_0 = arith.constant 0 : i32
    %c0_i32_1 = arith.constant 0 : i32
    return %arg0, %c0_i32, %c0_i32_0 : i32, i32, i32
  }
}

</mosaic_0001>

<bundles_post_ra>
// kernel: critic_rollout.1
= control target key start
LH: loop header
LB: loop body
LE: loop exit
PB: predicated region body
PF: predicated region fallthrough
CT: control target
= control target key end

     0   :  { %s1916_s0 = inlined_call_operand.hbm [shape: f32[5,8,12], index: 0, kind: input, shape index: {}]   ;;  %s1917_s1 = inlined_call_operand.vmem [shape: f32[5,8,12], index: 1, kind: input, shape index: {}]   ;;  %s1918_s2 = inlined_call_operand.vmem [shape: f32[5,8,4], index: 2, kind: input, shape index: {}]   ;;  %s1919_s3 = inlined_call_operand.vmem [shape: f32[5,8,4], index: 3, kind: input, shape index: {}]   ;;  %s1920_s4 = inlined_call_operand.hbm [shape: f32[8,32], index: 4, kind: input, shape index: {}]   ;;  %s1921_s5 = inlined_call_operand.hbm [shape: f32[12,32], index: 5, kind: input, shape index: {}]   ;;  %s1922_s6 = inlined_call_operand.hbm [shape: f32[12,32], index: 6, kind: input, shape index: {}]   ;;  %s1923_s7 = inlined_call_operand.vmem [shape: f32[4,32], index: 7, kind: input, shape index: {}]   ;;  %s1924_s8 = inlined_call_operand.vmem [shape: f32[4,32], index: 8, kind: input, shape index: {}]   ;;  %s1925_s9 = inlined_call_operand.vmem [shape: f32[1,32], index: 9, kind: input, shape index: {}]   ;;  %s1926_s10 = inlined_call_operand.vmem [shape: f32[64,128], index: 10, kind: input, shape index: {}]   ;;  %s1927_s11 = inlined_call_operand.hbm [shape: f32[1,128], index: 11, kind: input, shape index: {}]   ;;  %s1928_s12 = inlined_call_operand.hbm [shape: f32[32,128], index: 12, kind: input, shape index: {}]   ;;  %s1929_s13 = inlined_call_operand.hbm [shape: f32[1,128], index: 13, kind: input, shape index: {}]   ;;  %s1930_s14 = inlined_call_operand.vmem [shape: f32[5,8,128], index: 14, kind: output, shape index: {0}]   ;;  %s1931_s15 = inlined_call_operand.hbm [shape: f32[5,8,32], index: 15, kind: output, shape index: {1}]  }
   0x1   :  { %1934 = sst [smem:[#allocation21_spill]] %s1916_s0 }
   0x2   :  { %1935 = sst [smem:[#allocation22_spill]] %s1917_s1 }
   0x3   :  { %1936 = sst [smem:[#allocation23_spill]] %s1920_s4 }
   0x4   :  { %1937 = sst [smem:[#allocation24_spill]] %s1921_s5 }
   0x5   :  { %1938 = sst [smem:[#allocation25_spill]] %s1922_s6 }
   0x6   :  { %1939 = sst [smem:[#allocation26_spill]] %s1923_s7 }
   0x7   :  { %1940 = sst [smem:[#allocation27_spill]] %s1924_s8 }
   0x8   :  { %1941 = sst [smem:[#allocation28_spill]] %s1925_s9 }
   0x9   :  { %1942 = sst [smem:[#allocation29_spill]] %s1926_s10 }
   0xa   :  { %1943 = sst [smem:[#allocation30_spill]] %s1927_s11 }
   0xb   :  { %1944 = sst [smem:[#allocation31_spill]] %s1928_s12 }
   0xc   :  { %1945 = sst [smem:[#allocation32_spill]] %s1931_s15 }
   0xd   :  { %21 = vsyncpa [#allocation4], 0 }
   0xe   :  { %23 = vsyncpa [#allocation4 + $0x1], 0 }
   0xf   :  { %24 = vsyncpa [#allocation7], 0 }
  0x10   :  { %25 = vsyncpa [#allocation10], 0 }
  0x11   :  { %26 = vsyncpa [#allocation13], 0 }
  0x12   :  { %27 = vsyncpa [#allocation5], 0 }
  0x13   :  { %29 = vsyncpa [#allocation5 + $0x1], 0  ;;  %s1654_s18 = smov 0   ;;  %s1656_s19 = smov 0  }
  0x14   :  { %s1658_s20 = smov 0   ;;  %s1660_s21 = smov 0  }
  0x15 LB: > { %s1946_s4 = sld [smem:[#allocation23_spill]]  ;;  %s1678_s25 = sadd.s32 4294967295, %s1561_s21   ;;  %s1561_s21 = sphi %s1660_s21, %s1970_s21   ;;  %s1557_s20 = sphi %s1658_s20, %s1969_s20   ;;  %s1553_s19 = sphi %s1656_s19, %s1968_s19   ;;  %s1549_s18 = sphi %s1654_s18, %s1967_s18  }
  0x16   : > { %p1114_p0 = scmp.ge.s32.totalorder %s1561_s21, 1  ;;  %p56_p1 = scmp.eq.s32.totalorder %s1678_s25, 0 }
  0x17   : > { %p406_p2 = scmp.lt.s32.totalorder %s1561_s21, 6  ;;  %s1563_s27 = smov [#allocation6]  }
  0x18   : > { %s420_s28 = sshll.u32 %s1563_s27, 4  ;;  %s1948_s6 = sld [smem:[#allocation25_spill]]  ;;  %s421_s28 = int_to_ptr.vmem [resolvable:$true] %s420_s28 }
  0x19   : > { %p1684_p4 = pnand %p1114_p0, %p406_p2  ;;  %s1950_s12 = sld [smem:[#allocation31_spill]] }
  0x1a   : > { %s1565_s29 = smov 128   ;;  %s1566_s30 = smov 8  }
  0x1b   : > { %s418_s24 = sshll.u32 %s1946_s4, 4  ;;  %p1180_p5 = pneg %p1684_p4  ;;  %s419_s24 = int_to_ptr.hbm [resolvable:$true] %s418_s24 }
  0x1c   : > { %s1564_s4 = smov [#allocation9]   ;;  %s1951_s5 = sld [smem:[#allocation24_spill]] }
  0x1d   : > { %p1695_p6 = pnand %p1180_p5, %p56_p1  ;;  %s445_s15 = sshll.u32 %s1564_s4, 4  ;;  %s446_s15 = int_to_ptr.vmem [resolvable:$true] %s445_s15 }
  0x1e   : > { %s443_s16 = sshll.u32 %s1948_s6, 4  ;;  %s1567_s8 = smov [#allocation12]   ;;  %s444_s16 = int_to_ptr.hbm [resolvable:$true] %s443_s16 }
  0x1f   : > { %s481_s27 = sshll.u32 %s1950_s12, 4  ;;  %s483_s7 = sshll.u32 %s1567_s8, 4  ;;  %s482_s27 = int_to_ptr.hbm [resolvable:$true] %s481_s27  ;;  %s484_s7 = int_to_ptr.vmem [resolvable:$true] %s483_s7 }
  0x20   : > { %1183 = dma.hbm_to_vmem [thread:$0]  (!%p1695_p6), %s419_s24, 128, %s421_s28, [#allocation7]  }
  0x21   : > { %1189 = dma.hbm_to_vmem [thread:$0]  (!%p1695_p6), %s444_s16, 256, %s446_s15, [#allocation10], %s1565_s29, %s1565_s29, %s1566_s30  }
  0x22   : > { %s429_s10 = sshll.u32 %s1951_s5, 4  ;;  %s1568_s4 = smov [#allocation8]   ;;  %s430_s10 = int_to_ptr.hbm [resolvable:$true] %s429_s10 }
  0x23   : > { %1195 = dma.hbm_to_vmem [thread:$0]  (!%p1695_p6), %s482_s27, 512, %s484_s7, [#allocation13], %s1565_s29, %s1565_s29, %s1566_s30  }
  0x24   : > { %s431_s24 = sshll.u32 %s1568_s4, 4  ;;  %s1952_s11 = sld [smem:[#allocation30_spill]]  ;;  %s432_s24 = int_to_ptr.vmem [resolvable:$true] %s431_s24 }
  0x25   : > { %1186 = dma.hbm_to_vmem [thread:$0]  (!%p1695_p6), %s430_s10, 256, %s432_s24, [#allocation7], %s1565_s29, %s1565_s29, %s1566_s30  }
  0x26   : > { %s496_s7 = sshll.u32 %s1929_s13, 4  ;;  %s1569_s9 = smov [#allocation11]   ;;  %s497_s7 = int_to_ptr.hbm [resolvable:$true] %s496_s7 }
  0x27   : > { %s472_s16 = sshll.u32 %s1569_s9, 4  ;;  %s1570_s23 = smov [#allocation14]   ;;  %s473_s16 = int_to_ptr.vmem [resolvable:$true] %s472_s16 }
  0x28   : > { %s498_s10 = sshll.u32 %s1570_s23, 4  ;;  %s1113_s27 = sadd.s32 4294967294, %s1561_s21   ;;  %s499_s10 = int_to_ptr.vmem [resolvable:$true] %s498_s10 }
  0x29   : > { %1198 = dma.hbm_to_vmem [thread:$0]  (!%p1695_p6), %s497_s7, 16, %s499_s10, [#allocation13]  }
  0x2a   : > { %s470_s15 = sshll.u32 %s1952_s11, 4  ;;  %s1725_s29 = sadd.s32 1, %s1561_s21   ;;  %s471_s15 = int_to_ptr.hbm [resolvable:$true] %s470_s15 }
  0x2b   : > { %1192 = dma.hbm_to_vmem [thread:$0]  (!%p1695_p6), %s471_s15, 16, %s473_s16, [#allocation10]  }
  0x2c   : > { %s39_s30 = ssub.s32 %s1561_s21, %s1725_s29  ;;  %s42_s4 = sadd.s32 1, %s1557_s20 }
  0x2d   : > { %p40_p7 = scmp.eq.s32.totalorder %s39_s30, 0  ;;  %p49_p8 = scmp.ne.s32.totalorder %s1557_s20, %s1553_s19 }
  0x2e   : > { %p50_p9 = scmp.eq.s32.totalorder %s1561_s21, 0  ;;  %p55_p10 = scmp.ne.s32.totalorder %s1553_s19, %s1549_s18 }
  0x2f   : > { %s1736_s24 = scalar_select %p40_p7, %s1557_s20, %s42_s4  }
  0x30   : > { %p1738_p11 = por %p50_p9, %p49_p8  ;;  %p1744_p12 = por %p56_p1, %p55_p10 }
  0x31   : > { %p393_p13 = scmp.eq.s32.totalorder %s1678_s25, 4  ;;  %p399_p0 = scmp.eq.s32.totalorder %s1113_s27, 4 }
  0x32   : > { %p1213_p2 = scmp.lt.s32.totalorder %s1561_s21, 5  ;;  %s509_s22 = sand.u32 1, %s1557_s20  }
  0x33   : > { %p1751_p5 = por %p393_p13, %p49_p8  ;;  %p1755_p6 = por %p399_p0, %p55_p10 }
  0x34   : > { %s1122_s8 = sshll.u32 %s509_s22, 3  ;;  %s1123_s7 = sshll.u32 %s1561_s21, 3 }
  0x35   : > { %s1957_s0 = sld [smem:[#allocation21_spill]]  ;;  %s513_s10 = scalar_lea.vmem [#allocation3], %s1122_s8 }
  0x36   : > { %s521_s30 = sshll.u32 %s513_s10, 4  ;;  %p1765_p7 = pnand %p1213_p2, %p1738_p11  ;;  %s522_s30 = int_to_ptr.vmem [resolvable:$true] %s521_s30 }
  0x37   : > { %s510_s5 = scalar_lea.sflag [#allocation4], %s509_s22 }
  0x38   : > { %p1457_p9 = pneg %p1765_p7 }
  0x3b   : > { %s517_s23 = scalar_lea.hbm %s1957_s0, %s1123_s7  ;;  %s1460_s9 = scalar_lea.hbm %s1957_s0, 40 }
  0x3c   : > { %s519_s4 = sshll.u32 %s517_s23, 4  ;;  %s520_s4 = int_to_ptr.hbm [resolvable:$true] %s519_s4 }
  0x3d   : > { %s1453_s11 = sshra.s32 %s520_s4, 4  ;;  %s1454_s11 = int_to_ptr.hbm [resolvable:$true] %s1453_s11 }
  0x3e   : > { %s1455_s12 = scalar_lea.hbm %s1454_s11, 8  ;;  %p1461_p11 = scmp.lt.s32.totalorder %s1454_s11, %s1957_s0 }
  0x3f   : > { %p1456_p8 = scmp.ne.s32.totalorder %s1454_s11, %s1455_s12  ;;  %p1462_p0 = scmp.lt.s32.totalorder %s1460_s9, %s1455_s12 }
  0x41   : > { %p1458_p10 = pnand %p1457_p9, %p1456_p8  ;;  %p1463_p2 = por %p1462_p0, %p1461_p11 }
  0x43   : > { %p1459_p13 = pneg %p1458_p10 }
  0x45   : > { %p1464_p3 = pnand %p1463_p2, %p1459_p13 }
  0x47   : > { %1467 = shalt.err (!%p1464_p3)
}
  0x48   : > { %1202 = dma.hbm_to_vmem [thread:$0]  (!%p1765_p7), %s520_s4, 128, %s522_s30, %s510_s5  }
  0x49   : > { %551 = sbr.rel (%p1684_p4) target bundleno = 964 (0x3c4), region = 76  ;;  %s1782_s22 = sand.u32 (!%p1684_p4), 1, %s1553_s19  }
  0x4a   : > { %s1125_s23 = sshll.u32 (!%p1684_p4), %s1782_s22, 3  ;;  %s554_s10 = scalar_lea.sflag (!%p1684_p4), [#allocation4], %s1782_s22 }
  0x4b   : > { %s1786_s8 = scalar_lea.vmem (!%p1684_p4), [#allocation3], %s1125_s23 }
  0x4e   : > { %1528 = dma.done.wait (%p1744_p12), %s554_s10, 128  }
  0x4f   : > { %1530 = vsyncadd (%p1744_p12), %s554_s10, 4294967168 }
  0x50   : > { %1532 = dma.done.wait (%p56_p1), [#allocation7], 384  }
  0x51   : > { %1534 = vsyncadd (%p56_p1), [#allocation7], 4294966912 }
  0x52   : > { %1536 = dma.done.wait (%p56_p1), [#allocation10], 272  }
  0x53   : > { %1538 = vsyncadd (%p56_p1), [#allocation10], 4294967024 }
  0x54   : > { %1540 = dma.done.wait (%p56_p1), [#allocation13], 528  }
  0x55   : > { %1542 = vsyncadd (%p56_p1), [#allocation13], 4294966768  ;;  %p651_p3 = scmp.lt.s32.totalorder %s1678_s25, 4  ;;  %s1959_s1 = sld [smem:[#allocation22_spill]] }
  0x56   : > { %s1824_s0 = scalar_lea.vmem [#allocation15], %s1125_s23  ;;  %p1960_p1 = scmp.ne.s32.totalorder %s1678_s25, 0 }
  0x57   : > { %s652_s5 = scalar_select %p651_p3, %s1678_s25, 4 }
  0x58   : > { %670 = sbr.rel (%p1960_p1) target bundleno = 95 (0x5f), region = 108 }
  0x59   : > { %s1806_s11 = sshll.u32 %s652_s5, 3 }
  0x5a   : > { %s658_s27 = scalar_lea.vmem %s1918_s2, %s1806_s11  ;;  %s662_s16 = scalar_lea.vmem %s1919_s3, %s1806_s11 }
  0x5b   : > { %s654_s17 = scalar_lea.vmem %s1959_s1, %s1806_s11 }
  0x5d   : > { %v671_v0 = vld [vmem:[#allocation6] sm:$0xff]  ;;  %vm672_vm0 = vcmask 261120  }
  0x5e   : > { %673 = vst.msk [vmem:[#allocation2] sm:$0xff] %vm672_vm0, %v671_v0 }
  0x5f PF: > { %v680_v1 = vld [vmem:[#allocation9 + $0x8] sm:$0xf]  ;;  %vm685_vm1 = vcmask 1043456   ;;  %v677_v2 = vld [vmem:[#allocation8 + $0x8] sm:$0xf]  ;;  %v679_v3 = vld [vmem:[#allocation9] sm:$0xff] }
  0x60   : > { %1138 = vmatpush.msk.msra.mxu0 %vm685_vm1, %v680_v1  ;;  %1140 = vmatpush.msk.msra.mxu1 %vm685_vm1, %v677_v2  ;;  %v676_v4 = vld [vmem:[#allocation8] sm:$0xff]  ;;  %vm681_vm2 = vcmask 97280   ;;  %v675_v6 = vld [vmem:[%s1786_s8] sm:$0xff]  ;;  %s1961_s26 = sld [smem:[#allocation26_spill]]  ;;  %vm737_vm3 = vcmask 31744   ;;  %s1571_s8 = smov 32  }
  0x61   : > { %v678_v5 = vld [vmem:[%s654_s17] sm:$0xff]  ;;  %s1962_s7 = sld [smem:[#allocation27_spill]]  ;;  %vm804_vm4 = vcmask 261120   ;;  %vm818_vm5 = vcmask 523264   ;;  %s1573_s17 = smov 96   ;;  %v868_v46 = vld [vmem:[#allocation12 + $0x10] sm:$0xff] }
  0x62   : > { %704 = vmatpush.msra.mxu0 %v679_v3  ;;  %730 = vmatpush.msra.mxu1 %v676_v4  ;;  %v765_v9 = vld [vmem:[%s662_s16] sm:$0xff]  ;;  %s1963_s16 = sld [smem:[#allocation29_spill]]  ;;  %v867_v47 = vld [vmem:[#allocation12 + $0x8] sm:$0xff]  ;;  %s923_s12 = sshll.u32 %s1824_s0, 4  ;;  %s924_s12 = int_to_ptr.vmem [resolvable:$true] %s923_s12 }
  0x63   : > { %1139 = vmatmul.msk.f32.vlgmr.msra.gmra.mxu0 %vm681_vm2, %v678_v5  ;;  %1141 = vmatmul.msk.f32.vlgmr.msra.gmra.mxu1 %vm681_vm2, %v675_v6  ;;  %v735_v11 = vld [vmem:[%s658_s27] sm:$0xff]  ;;  %s1572_s27 = smov 64   ;;  %s1965_s10 = sld [smem:[#allocation32_spill]] }
  0x64   : > { %v1265_v32 = vld [vmem:[#allocation11] ss:$0 sm:$0xff]  ;;  %v866_v48 = vld [vmem:[#allocation12] sm:$0xff]  ;;  %s908_s30 = scalar_lea.sflag [#allocation5], %s1782_s22 }
  0x65   : > { %v674_v10 = vld [vmem:[#allocation2] sm:$0xff] }
  0x66   : > { %v736_v7 = vld [vmem:[%s1961_s26] sm:$0xf]  ;;  %801 = vrot.lane.b32.xlu0 %v674_v10, %s1571_s8 }
  0x67   : > { %v766_v8 = vld [vmem:[%s1962_s7] sm:$0xf]  ;;  %1142 = vmatpush.msk.msrb.mxu0 %vm685_vm1, %v736_v7  ;;  %s1964_s7 = sld [smem:[#allocation28_spill]] }
  0x68   : > { %1144 = vmatpush.msk.msra.mxu3 %vm685_vm1, %v766_v8  ;;  %v813_v12 = vld [vmem:[%s1963_s16 + $0x38] sm:$0xff]  ;;  %v812_v13 = vld [vmem:[%s1963_s16 + $0x30] sm:$0xff]  ;;  %v811_v14 = vld [vmem:[%s1963_s16 + $0x28] sm:$0xff] }
  0x69   : > { %1145 = vmatmul.msk.f32.vlgmr.msra.gmra.mxu3 %vm737_vm3, %v765_v9  ;;  %830 = vmatpush.msra.mxu2 %v813_v12  ;;  %v810_v15 = vld [vmem:[%s1963_s16 + $0x20] sm:$0xff]  ;;  %v809_v16 = vld [vmem:[%s1963_s16 + $0x18] sm:$0xff]  ;;  %v808_v17 = vld [vmem:[%s1963_s16 + $0x10] sm:$0xff] }
  0x6a   : > { %v807_v18 = vld [vmem:[%s1963_s16 + $0x8] sm:$0xff]  ;;  %v806_v19 = vld [vmem:[%s1963_s16] sm:$0xff] }
  0x6b   : > { %1143 = vmatmul.msk.f32.vlgmr.msrb.gmra.mxu0 %vm737_vm3, %v735_v11  ;;  %831 = vmatpush.msra.mxu2 %v812_v13  ;;  %v869_v45 = vld [vmem:[#allocation12 + $0x18] sm:$0xff] }
  0x6c   : > { %891 = vmatpush.msrb.mxu3 %v869_v45 }
  0x6d   : > { %832 = vmatpush.msra.mxu2 %v811_v14  ;;  %v1264_v26 = vld [vmem:[%s1964_s7] ss:$0 sm:$0xff] }
  0x6e   : > { %892 = vmatpush.msrb.mxu3 %v868_v46 }
  0x6f   : > { %833 = vmatpush.msra.mxu2 %v810_v15 }
  0x70   : > { %893 = vmatpush.msrb.mxu3 %v867_v47 }
  0x71   : > { %834 = vmatpush.msra.mxu2 %v809_v16 }
  0x72   : > { %894 = vmatpush.msrb.mxu3 %v866_v48 }
  0x73   : > { %835 = vmatpush.msra.mxu2 %v808_v17 }
  0x75   : > { %836 = vmatpush.msra.mxu2 %v807_v18 }
  0x77   : > { %837 = vmatpush.msra.mxu2 %v806_v19 }
  0xd8   : > { %v802_v29 = vpop.permute.xlu0 %801 }
  0xe0   : > { %v706_v20 = vpop.f32.mrf.mxu0  ;;  %v732_v21 = vpop.f32.mrf.mxu1 }
  0xe1   : > { %v733_v22 = vadd.f32 %v732_v21, %v706_v20 }
  0xe8   : > { %v761_v23 = vpop.f32.mrf.mxu0 }
  0xe9   : > { %v764_v25 = vadd.f32 %v761_v23, %v733_v22 }
  0xec   : > { %v790_v24 = vpop.f32.mrf.mxu3 }
  0xed   : > { %v793_v27 = vadd.f32 %v790_v24, %v764_v25 }
  0xef   : > { %v798_v28 = vadd.f32 %v1264_v26, %v793_v27 }
  0xf1   : > { %v799_v30 = vmax.f32 %v798_v28, 0.0 }
  0xf3   : > { %v805_v31 = vsel %vm804_vm4, %v799_v30, %v802_v29 }
  0xf4   : > { %1146 = vmatmul.msk.f32.vlgmr.msra.gmra.mxu2 %vm818_vm5, %v805_v31 }
 0x177   : > { %v839_v33 = vpop.f32.mrf.mxu2 }
 0x178   : > { %v840_v34 = vadd.f32 %v1265_v32, %v839_v33 }
 0x17a   : > { %848 = vrot.lane.b32.xlu0 %v840_v34, %s1571_s8  ;;  %v842_v35 = vsub.f32 0.0, %v840_v34  ;;  %s1149_s8 = sshll.u32 %s1678_s25, 3  ;;  %s1503_s25 = scalar_lea.hbm %s1965_s10, 40 }
 0x17b   : > { %s921_s23 = scalar_lea.hbm %s1965_s10, %s1149_s8 }
 0x17c   : > { %v843_v36 = vmul.f32 1.442695, %v842_v35  ;;  %s925_s26 = sshll.u32 %s921_s23, 4  ;;  %s926_s26 = int_to_ptr.hbm [resolvable:$true] %s925_s26 }
 0x17d   : > { %s1497_s4 = sshra.s32 %s926_s26, 4  ;;  %s1498_s4 = int_to_ptr.hbm [resolvable:$true] %s1497_s4 }
 0x17e   : > { %1267 = vpow2.f32 %v843_v36  ;;  %s1499_s7 = scalar_lea.hbm %s1498_s4, 8  ;;  %p1504_p8 = scmp.lt.s32.totalorder %s1498_s4, %s1965_s10 }
 0x17f   : > { %p1500_p4 = scmp.ne.s32.totalorder %s1498_s4, %s1499_s7  ;;  %p1505_p9 = scmp.lt.s32.totalorder %s1503_s25, %s1499_s7 }
 0x181   : > { %p1501_p12 = pnand %p1500_p4, %p1751_p5  ;;  %p1506_p10 = por %p1505_p9, %p1504_p8 }
 0x183   : > { %p1502_p7 = pneg %p1501_p12 }
 0x184   : > { %v1268_v37 = vpop.eup %1267 }
 0x185   : > { %v845_v38 = vadd.f32 1.0, %v1268_v37  ;;  %p1507_p13 = pnand %p1506_p10, %p1502_p7 }
 0x187   : > { %1269 = vrcp.f32 %v845_v38 }
 0x18d   : > { %v1270_v39 = vpop.eup %1269 }
 0x18e   : > { %v858_v49 = vsub.f32 1.0, %v1270_v39  ;;  %v864_v52 = vmul.f32 %v1270_v39, %v802_v29 }
 0x1ec   : > { %v849_v40 = vpop.permute.xlu0 %848 }
 0x1ed   : > { %v851_v41 = vmul.f32 %v1270_v39, %v849_v40 }
 0x1ef   : > { %853 = vrot.lane.b32.xlu1 %v851_v41, %s1572_s27 }
 0x261   : > { %v854_v42 = vpop.permute.xlu1 %853 }
 0x262   : > { %v856_v43 = vadd.f32 %v854_v42, %v840_v34 }
 0x264   : > { %1271 = vtanh.f32 %v856_v43 }
 0x26a   : > { %v1272_v44 = vpop.eup %1271 }
 0x26b   : > { %860 = vrot.lane.b32.xlu1 %v1272_v44, %s1573_s17 }
 0x2dd   : > { %v861_v50 = vpop.permute.xlu1 %860 }
 0x2de   : > { %v863_v51 = vmul.f32 %v861_v50, %v858_v49 }
 0x2e0   : > { %v865_v53 = vadd.f32 %v864_v52, %v863_v51 }
 0x2e2   : > { %875 = vrot.lane.b32.xlu2 %v865_v53, %s1573_s17 }
 0x33c   : > { %v876_v54 = vpop.permute.xlu2 %875 }
 0x33d   : > { %901 = vst.msk [vmem:[%s1824_s0] sm:$0xff] %vm804_vm4, %v876_v54  ;;  %1147 = vmatmul.msk.f32.vlgmr.msrb.gmra.mxu3 %vm804_vm4, %v876_v54 }
 0x33e   : > { %902 = vst.msk [vmem:[#allocation2] sm:$0xff] %vm804_vm4, %v876_v54 }
 0x33f   : > { %1510 = shalt.err (!%p1507_p13)
}
 0x340   : > { %1178 = dma.vmem_to_hbm [thread:$0]  (%p1751_p5), %s924_s12, 128, %s926_s26, %s908_s30   ;;  %v1266_v55 = vld [vmem:[#allocation14] ss:$0 sm:$0xff] }
 0x341   : > { %s1966_s8 = scalar_lea.vmem %s1930_s14, %s1806_s11 }
 0x3c0   : > { %v896_v56 = vpop.f32.mrf.mxu3 }
 0x3c1   : > { %v897_v57 = vadd.f32 %v1266_v55, %v896_v56 }
 0x3c3   : > { %899 = vst [vmem:[%s1966_s8] sm:$0xff] %v897_v57 }
 0x3c4 PF: > { %p1220_p11 = scmp.ge.s32.totalorder %s1561_s21, 2  ;;  %s944_s1 = sand.u32 1, %s1549_s18  }
 0x3c5   : > { %s945_s15 = scalar_lea.sflag [#allocation5], %s944_s1 }
 0x3c6   : > { %p1204_p0 = pnand %p1220_p11, %p1755_p6 }
 0x3c8   : > { %p1205_p2 = pneg %p1204_p0 }
 0x3ca   : > { %1544 = dma.done.wait (%p1205_p2), %s945_s15, 128  }
 0x3cb   : > { %1546 = vsyncadd (%p1205_p2), %s945_s15, 4294967168  ;;  %p32_p5 = scmp.ge.s32.totalorder %s1725_s29, 7   ;;  %s1967_s18 = smov %s1553_s19 }
 0x3cc   : > { %s1968_s19 = smov %s1557_s20  ;;  %s1969_s20 = smov %s1736_s24 }
 0x3cd   : > { %s1970_s21 = smov %s1725_s29  ;;  %34 = sbr.rel (!%p32_p5) target bundleno = 21 (0x15), region = 170 }
 0x3d2   :  { %951 = vsyncpa [#allocation4], 1 }
 0x3d3   :  { %953 = vsyncpa [#allocation4 + $0x1], 1 }
 0x3d4   :  { %954 = vsyncpa [#allocation7], 1 }
 0x3d5   :  { %955 = vsyncpa [#allocation10], 1 }
 0x3d6   :  { %956 = vsyncpa [#allocation13], 1 }
 0x3d7   :  { %957 = vsyncpa [#allocation5], 1 }
 0x3d8   :  { %959 = vsyncpa [#allocation5 + $0x1], 1 }

</bundles_post_ra>
